<compile_context>
chip_gen: v5e
topology: v5e:2x2
jax: 0.10.0
libtpu: 0.0.40
codegen_flags: <defaults>
</compile_context>

<pallas_src>
import functools

import jax
import jax.numpy as jnp
from jax.experimental import pallas as pl
from jax.experimental.pallas import tpu as pltpu

BN_EPS = 1e-5


# ---------------------------------------------------------------------------
# Pallas kernels
# ---------------------------------------------------------------------------
def _swish(y):
    return y * (1.0 / (1.0 + jnp.exp(-y)))        # Swish: x * sigmoid(x) (EUP exp)


def _conv_bn_act_kernel(p_ref, w_ref, b_ref, o_ref, *, apply_swish):
    """out = [swish](patches @ W_folded + shift)."""
    y = jnp.dot(p_ref[...], w_ref[...], preferred_element_type=jnp.float32)
    y = y + b_ref[...]
    if apply_swish:
        y = _swish(y)
    o_ref[...] = y.astype(o_ref.dtype)


def _conv_bn_res_act_kernel(p_ref, w_ref, b_ref, r_ref, o_ref):
    """out = swish(patches @ W_folded + shift + residual)."""
    y = jnp.dot(p_ref[...], w_ref[...], preferred_element_type=jnp.float32)
    y = y + b_ref[...] + r_ref[...].astype(jnp.float32)
    o_ref[...] = _swish(y).astype(o_ref.dtype)


def _conv_bn_ds_res_act_kernel(p_ref, w_ref, b_ref, pd_ref, wd_ref, bd_ref, o_ref):
    """Fused conv2+bn2 and the 1x1-conv+bn downsample identity in one kernel:
       out = swish(p2 @ W2 + s2 + (xd @ Wd + sd))."""
    ident = jnp.dot(pd_ref[...], wd_ref[...], preferred_element_type=jnp.float32)
    ident = ident + bd_ref[...]
    y = jnp.dot(p_ref[...], w_ref[...], preferred_element_type=jnp.float32)
    y = y + b_ref[...] + ident
    o_ref[...] = _swish(y).astype(o_ref.dtype)


def _gap_kernel(x_ref, o_ref):
    """Global average pool over the flattened spatial axis: (N,S,C) -> (N,C)."""
    o_ref[...] = jnp.mean(x_ref[...].astype(jnp.float32), axis=1).astype(o_ref.dtype)


# ---------------------------------------------------------------------------
# Pallas launchers
# ---------------------------------------------------------------------------
def _pick_tile_m(m, cap=512):
    """Largest M-tile <= cap dividing M with a multiple-of-8 sublane extent;
    fall back to the full extent for small / indivisible M (valid per the
    'equals full array dim' exception)."""
    if m <= cap or m % 8 != 0:
        return m
    for t in (512, 256, 128, 64, 32, 16, 8):
        if m % t == 0:
            return t
    return m


_PARALLEL = pltpu.CompilerParams(dimension_semantics=("parallel",))


def conv_bn_act(patches, w, b, *, apply_swish):
    """(M, K) @ (K, C) + shift [-> swish] as one Pallas call."""
    m, k = patches.shape
    c = w.shape[1]
    tm = _pick_tile_m(m)
    return pl.pallas_call(
        functools.partial(_conv_bn_act_kernel, apply_swish=apply_swish),
        out_shape=jax.ShapeDtypeStruct((m, c), patches.dtype),
        grid=(m // tm,),
        in_specs=[
            pl.BlockSpec((tm, k), lambda i: (i, 0)),
            pl.BlockSpec((k, c), lambda i: (0, 0)),
            pl.BlockSpec((1, c), lambda i: (0, 0)),
        ],
        out_specs=pl.BlockSpec((tm, c), lambda i: (i, 0)),
        compiler_params=_PARALLEL,
    )(patches, w, b.reshape(1, c))


def conv_bn_res_act(patches, w, b, residual):
    """(M, K) @ (K, C) + shift + residual -> swish as one Pallas call."""
    m, k = patches.shape
    c = w.shape[1]
    tm = _pick_tile_m(m)
    return pl.pallas_call(
        _conv_bn_res_act_kernel,
        out_shape=jax.ShapeDtypeStruct((m, c), patches.dtype),
        grid=(m // tm,),
        in_specs=[
            pl.BlockSpec((tm, k), lambda i: (i, 0)),
            pl.BlockSpec((k, c), lambda i: (0, 0)),
            pl.BlockSpec((1, c), lambda i: (0, 0)),
            pl.BlockSpec((tm, c), lambda i: (i, 0)),
        ],
        out_specs=pl.BlockSpec((tm, c), lambda i: (i, 0)),
        compiler_params=_PARALLEL,
    )(patches, w, b.reshape(1, c), residual)


def conv_bn_downsample_res_act(patches, w, b, ds_patches, wd, bd):
    """Fused conv2+bn2 + 1x1-downsample identity + add + swish, one Pallas call."""
    m, k = patches.shape
    c = w.shape[1]
    kd = ds_patches.shape[1]
    tm = _pick_tile_m(m)
    return pl.pallas_call(
        _conv_bn_ds_res_act_kernel,
        out_shape=jax.ShapeDtypeStruct((m, c), patches.dtype),
        grid=(m // tm,),
        in_specs=[
            pl.BlockSpec((tm, k), lambda i: (i, 0)),
            pl.BlockSpec((k, c), lambda i: (0, 0)),
            pl.BlockSpec((1, c), lambda i: (0, 0)),
            pl.BlockSpec((tm, kd), lambda i: (i, 0)),
            pl.BlockSpec((kd, c), lambda i: (0, 0)),
            pl.BlockSpec((1, c), lambda i: (0, 0)),
        ],
        out_specs=pl.BlockSpec((tm, c), lambda i: (i, 0)),
        compiler_params=_PARALLEL,
    )(patches, w, b.reshape(1, c), ds_patches, wd, bd.reshape(1, c))


def global_avg_pool(x_nsc):
    """x: (N, S, C) -> (N, C) via a Pallas reduction kernel."""
    n, s, c = x_nsc.shape
    return pl.pallas_call(
        _gap_kernel,
        out_shape=jax.ShapeDtypeStruct((n, c), x_nsc.dtype),
        grid=(1,),
        in_specs=[pl.BlockSpec((n, s, c), lambda i: (0, 0, 0))],
        out_specs=pl.BlockSpec((n, c), lambda i: (0, 0)),
    )(x_nsc)


# ---------------------------------------------------------------------------
# ResNet2D forward (Pallas path) -- wrapper-side layout plumbing
# ---------------------------------------------------------------------------
def _extract_patches_nhwc(x, ksize, stride, padding):
    """im2col: (N, H, W, C) -> (N, Ho, Wo, ksize*ksize*C)."""
    n, h, w, c = x.shape
    ho = (h + 2 * padding - ksize) // stride + 1
    wo = (w + 2 * padding - ksize) // stride + 1
    xp = jnp.pad(x, ((0, 0), (padding, padding), (padding, padding), (0, 0)))
    cols = []
    for kh in range(ksize):
        for kw in range(ksize):
            cols.append(
                xp[:, kh:kh + ho * stride:stride, kw:kw + wo * stride:stride, :])
    return jnp.concatenate(cols, axis=-1), ho, wo


def _fold_conv_bn(w, bn):
    """Fold eval-mode BatchNorm into the conv weight matrix at trace time.

    w: (Cout, Cin, kh, kw) (PyTorch layout). Returns (kh*kw*Cin, Cout) weight
    matrix (row order matches _extract_patches_nhwc) and a (Cout,) shift.
    """
    cout, cin, kh, kw = w.shape
    scale = bn["gamma"] / jnp.sqrt(bn["var"] + BN_EPS)
    shift = bn["beta"] - bn["mean"] * scale
    wmat = jnp.transpose(w, (2, 3, 1, 0)).reshape(kh * kw * cin, cout)
    return wmat * scale[None, :], shift


def resnet_block_forward(x, blk):
    """One ResNetBlock: swish(bn2(conv2(swish(bn1(conv1(x))))) + identity)."""
    n, h, w, cin = x.shape
    s = blk["stride"]
    planes = blk["conv1_w"].shape[0]

    # conv1 (3x3, stride s) + bn1 + swish  -- fused Pallas matmul
    p1, ho, wo = _extract_patches_nhwc(x, 3, s, 1)
    w1, b1 = _fold_conv_bn(blk["conv1_w"], blk["bn1"])
    m = n * ho * wo
    y1 = conv_bn_act(p1.reshape(m, -1), w1, b1, apply_swish=True)

    # conv2 (3x3, stride 1) + bn2 + residual add + swish
    p2, _, _ = _extract_patches_nhwc(y1.reshape(n, ho, wo, planes), 3, 1, 1)
    w2, b2 = _fold_conv_bn(blk["conv2_w"], blk["bn2"])

    if "convd_w" in blk:
        # 1x1-conv(stride s)+bn identity fused into the conv2 kernel: no extra
        # pallas_call and no HBM round-trip for the identity tensor.
        xd = x[:, ::s, ::s, :].reshape(m, cin)
        wd, bd = _fold_conv_bn(blk["convd_w"], blk["bnd"])
        out = conv_bn_downsample_res_act(p2.reshape(m, -1), w2, b2, xd, wd, bd)
    else:
        identity = x.reshape(m, planes)
        out = conv_bn_res_act(p2.reshape(m, -1), w2, b2, identity)
    return out.reshape(n, ho, wo, planes)


def resnet2d_forward(x_nchw, blocks, latent):
    """ResNet2D.forward (default path)."""
    x = jnp.transpose(x_nchw, (0, 2, 3, 1))     # NCHW -> NHWC (channels lane-dense)
    for blk in blocks:
        x = resnet_block_forward(x, blk)
    n, h, w, c = x.shape
    pooled = global_avg_pool(x.reshape(n, h * w, c))   # AdaptiveAvgPool2d((1,1))
    return pooled.reshape(-1, latent)                  # x.view(-1, latent)


# ---------------------------------------------------------------------------
# Parameter construction (mirrors ResNet2D.__init__ structure)
# ---------------------------------------------------------------------------
def _kaiming_fan_out(key, shape):
    cout, cin, kh, kw = shape
    std = (2.0 / (cout * kh * kw)) ** 0.5
    return std * jax.random.normal(key, shape, dtype=jnp.float32)


def _bn_params(key, c):
    k1, k2, k3, k4 = jax.random.split(key, 4)
    return {
        "gamma": 1.0 + 0.1 * jax.random.normal(k1, (c,), dtype=jnp.float32),
        "beta": 0.1 * jax.random.normal(k2, (c,), dtype=jnp.float32),
        "mean": 0.1 * jax.random.normal(k3, (c,), dtype=jnp.float32),
        "var": 1.0 + 0.1 * jnp.abs(jax.random.normal(k4, (c,), dtype=jnp.float32)),
    }


def build_resnet2d_params(key, latent, layers=(2, 2, 2, 2),
                          feature_maps=(8, 16, 32, 64)):
    """4 stride-2 stages (layers[i] blocks each) + one latent stage (1 block)."""
    blocks = []
    inplanes = 3
    stages = [(feature_maps[i], layers[i], 2) for i in range(len(layers))]
    stages.append((latent, 1, 1))          # _make_layer(block, latent, 1)
    for planes, nblocks, first_stride in stages:
        for b in range(nblocks):
            stride = first_stride if b == 0 else 1
            key, k1, k2, k3, k4, k5, k6 = jax.random.split(key, 7)
            blk = {
                "stride": stride,
                "conv1_w": _kaiming_fan_out(k1, (planes, inplanes, 3, 3)),
                "bn1": _bn_params(k2, planes),
                "conv2_w": _kaiming_fan_out(k3, (planes, planes, 3, 3)),
                "bn2": _bn_params(k4, planes),
            }
            if stride != 1 or inplanes != planes:
                blk["convd_w"] = _kaiming_fan_out(k5, (planes, inplanes, 1, 1))
                blk["bnd"] = _bn_params(k6, planes)
            blocks.append(blk)
            inplanes = planes
    return blocks


# ---------------------------------------------------------------------------
# Pure-JAX reference (mirrors the PyTorch forward, NCHW + lax.conv)
# ---------------------------------------------------------------------------
def _ref_conv(x, w, stride, padding):
    return jax.lax.conv_general_dilated(
        x, w, window_strides=(stride, stride),
        padding=((padding, padding), (padding, padding)),
        dimension_numbers=("NCHW", "OIHW", "NCHW"),
        precision=jax.lax.Precision.HIGHEST)


def _ref_bn(x, bn):
    scale = bn["gamma"] / jnp.sqrt(bn["var"] + BN_EPS)
    shift = bn["beta"] - bn["mean"] * scale
    return x * scale[None, :, None, None] + shift[None, :, None, None]


def _ref_swish(x):
    return x * (1.0 / (1.0 + jnp.exp(-x)))


def ref_resnet2d_forward(x, blocks, latent):
    for blk in blocks:
        identity = x
        out = _ref_swish(_ref_bn(_ref_conv(x, blk["conv1_w"], blk["stride"], 1),
                                 blk["bn1"]))
        out = _ref_bn(_ref_conv(out, blk["conv2_w"], 1, 1), blk["bn2"])
        if "convd_w" in blk:
            identity = _ref_bn(_ref_conv(x, blk["convd_w"], blk["stride"], 0),
                               blk["bnd"])
        x = _ref_swish(out + identity)
    x = jnp.mean(x, axis=(2, 3))            # AdaptiveAvgPool2d((1, 1))
    return x.reshape(-1, latent)


if __name__ == "__main__":
    key = jax.random.PRNGKey(0)
    kx, kp = jax.random.split(key)

    N, C, H, W = 2, 3, 16, 16
    latent = 32
    feature_maps = (8, 16, 32, 64)   # small stand-ins for the default (64,128,256,512)
    layers = (2, 2, 2, 2)

    x = jax.random.normal(kx, (N, C, H, W), dtype=jnp.float32)
    blocks = build_resnet2d_params(kp, latent, layers=layers,
                                   feature_maps=feature_maps)

    out = resnet2d_forward(x, blocks, latent)
    out = jax.block_until_ready(out)

    ref = ref_resnet2d_forward(x, blocks, latent)
    assert out.shape == (N, latent), out.shape
    # Loose-ish tolerance only to absorb MXU f32 accumulation-order differences
    # across 9 stacked blocks; structural bugs produce O(1) errors.
    assert jnp.allclose(out, ref, atol=2e-2, rtol=2e-2), \
        float(jnp.max(jnp.abs(out - ref)))

    print("KERNEL_OK")
</pallas_src>

<mosaic_0001>
module attributes {stable_mosaic.version = 11 : i64} {
  func.func @_conv_bn_act_kernel(%arg0: i32, %arg1: memref<128x27xf32, #tpu.memory_space<vmem>>, %arg2: memref<27x8xf32, #tpu.memory_space<vmem>>, %arg3: memref<1x8xf32, #tpu.memory_space<vmem>>, %arg4: memref<128x8xf32, #tpu.memory_space<vmem>>) attributes {dimension_semantics = [#tpu.dimension_semantics<parallel>], iteration_bounds = array<i64: 1>, scalar_prefetch = 0 : i64, scratch_operands = 0 : i64, tpu.core_type = #tpu.core_type<tc>, window_params = [{transform_indices = @transform_0, window_bounds = array<i64: 128, 27>}, {pipeline_mode = #tpu.pipeline_mode<synchronous>, transform_indices = @transform_1, window_bounds = array<i64: 27, 8>}, {pipeline_mode = #tpu.pipeline_mode<synchronous>, transform_indices = @transform_2, window_bounds = array<i64: 1, 8>}, {transform_indices = @transform_3, window_bounds = array<i64: 128, 8>}]} {
    %c0 = arith.constant 0 : index
    %c0_0 = arith.constant 0 : index
    %0 = vector.load %arg1[%c0, %c0_0] : memref<128x27xf32, #tpu.memory_space<vmem>>, vector<128x27xf32>
    %c0_1 = arith.constant 0 : index
    %c0_2 = arith.constant 0 : index
    %1 = vector.load %arg2[%c0_1, %c0_2] : memref<27x8xf32, #tpu.memory_space<vmem>>, vector<27x8xf32>
    %cst = arith.constant dense<0.000000e+00> : vector<128x8xf32>
    %2 = tpu.matmul %0, %1, %cst {dimension_numbers = #tpu.dot_dimension_numbers<[1], [0], [0], [1], [0, 0, 1, 1], [], []>} : vector<128x27xf32>, vector<27x8xf32>, vector<128x8xf32> -> vector<128x8xf32>
    %c0_3 = arith.constant 0 : index
    %c0_4 = arith.constant 0 : index
    %3 = vector.load %arg3[%c0_3, %c0_4] : memref<1x8xf32, #tpu.memory_space<vmem>>, vector<1x8xf32>
    %4 = vector.broadcast %3 : vector<1x8xf32> to vector<128x8xf32>
    %5 = arith.addf %2, %4 : vector<128x8xf32>
    %cst_5 = arith.constant 0.000000e+00 : f32
    %6 = vector.broadcast %cst_5 : f32 to vector<128x8xf32>
    %7 = arith.subf %6, %5 : vector<128x8xf32>
    %8 = math.exp %7 : vector<128x8xf32>
    %cst_6 = arith.constant 1.000000e+00 : f32
    %9 = vector.broadcast %cst_6 : f32 to vector<128x8xf32>
    %10 = arith.addf %9, %8 : vector<128x8xf32>
    %cst_7 = arith.constant 1.000000e+00 : f32
    %11 = vector.broadcast %cst_7 : f32 to vector<128x8xf32>
    %12 = arith.divf %11, %10 : vector<128x8xf32>
    %13 = arith.mulf %5, %12 : vector<128x8xf32>
    %c0_8 = arith.constant 0 : index
    %c0_9 = arith.constant 0 : index
    %14 = vector.load %arg4[%c0_8, %c0_9] : memref<128x8xf32, #tpu.memory_space<vmem>>, vector<128x8xf32>
    tpu.vector_store %arg4[%c0_8, %c0_9], %13 {strides = array<i32>} : memref<128x8xf32, #tpu.memory_space<vmem>>, vector<128x8xf32>,
    return
  }
  func.func @transform_0(%arg0: i32) -> (i32, i32) {
    %c0_i32 = arith.constant 0 : i32
    %c0_i32_0 = arith.constant 0 : i32
    return %arg0, %c0_i32 : i32, i32
  }
  func.func @transform_1(%arg0: i32) -> (i32, i32) {
    %c0_i32 = arith.constant 0 : i32
    %c0_i32_0 = arith.constant 0 : i32
    %c0_i32_1 = arith.constant 0 : i32
    return %c0_i32, %c0_i32_0 : i32, i32
  }
  func.func @transform_2(%arg0: i32) -> (i32, i32) {
    %c0_i32 = arith.constant 0 : i32
    %c0_i32_0 = arith.constant 0 : i32
    %c0_i32_1 = arith.constant 0 : i32
    return %c0_i32, %c0_i32_0 : i32, i32
  }
  func.func @transform_3(%arg0: i32) -> (i32, i32) {
    %c0_i32 = arith.constant 0 : i32
    %c0_i32_0 = arith.constant 0 : i32
    return %arg0, %c0_i32 : i32, i32
  }
}

</mosaic_0001>

<bundles_post_ra>
// kernel: tpu_custom_call.1
= control target key start
LH: loop header
LB: loop body
LE: loop exit
PB: predicated region body
PF: predicated region fallthrough
CT: control target
= control target key end

     0   :  { %vm87_vm0 = vcmask 1042432   ;;  %vm38_vm1 = vcmask 220160   ;;  %vm476_vm5 = vcmask 64512   ;;  %s1001_s1 = inlined_call_operand.vmem [shape: f32[27,8], index: 1, kind: input, shape index: {}]   ;;  %s1002_s0 = inlined_call_operand.vmem [shape: f32[128,27], index: 0, kind: input, shape index: {}]   ;;  %s1003_s2 = inlined_call_operand.vmem [shape: f32[1,8], index: 2, kind: input, shape index: {}]   ;;  %s1004_s3 = inlined_call_operand.vmem [shape: f32[128,8], index: 3, kind: output, shape index: {}]  }
   0x1   :  { %v33_v0 = vld [vmem:[%s1001_s1 + $0x18] sm:$0x7]  ;;  %v32_v1 = vld [vmem:[%s1001_s1 + $0x10] sm:$0xff]  ;;  %v31_v2 = vld [vmem:[%s1001_s1 + $0x8] sm:$0xff] }
   0x2   :  { %497 = vmatpush.msk.msra.mxu0 %vm87_vm0, %v33_v0  ;;  %514 = vmatpush.msk.msra.mxu1 %vm87_vm0, %v33_v0  ;;  %v30_v3 = vld [vmem:[%s1001_s1] sm:$0xff]  ;;  %v15_v8 = vld [vmem:[%s1002_s0 + $0x8] sm:$0xff]  ;;  %v16_v12 = vld [vmem:[%s1002_s0 + $0x10] sm:$0xff] }
   0x3   :  { %515 = vmatpush.msk.msra.mxu2 %vm87_vm0, %v33_v0  ;;  %516 = vmatpush.msk.msra.mxu3 %vm87_vm0, %v33_v0  ;;  %v14_v4 = vld [vmem:[%s1002_s0] sm:$0xff]  ;;  %v19_v9 = vld [vmem:[%s1002_s0 + $0x28] sm:$0xff]  ;;  %v20_v13 = vld [vmem:[%s1002_s0 + $0x30] sm:$0xff] }
   0x4   :  { %104 = vmatpush.msra.mxu0 %v32_v1  ;;  %517 = vmatpush.msra.mxu1 %v32_v1  ;;  %v18_v5 = vld [vmem:[%s1002_s0 + $0x20] sm:$0xff]  ;;  %v23_v10 = vld [vmem:[%s1002_s0 + $0x48] sm:$0xff]  ;;  %v24_v14 = vld [vmem:[%s1002_s0 + $0x50] sm:$0xff] }
   0x5   :  { %518 = vmatpush.msra.mxu2 %v32_v1  ;;  %519 = vmatpush.msra.mxu3 %v32_v1  ;;  %v22_v6 = vld [vmem:[%s1002_s0 + $0x40] sm:$0xff]  ;;  %v27_v11 = vld [vmem:[%s1002_s0 + $0x68] sm:$0xff]  ;;  %v28_v15 = vld [vmem:[%s1002_s0 + $0x70] sm:$0xff] }
   0x6   :  { %105 = vmatpush.msra.mxu0 %v31_v2  ;;  %520 = vmatpush.msra.mxu1 %v31_v2  ;;  %v26_v7 = vld [vmem:[%s1002_s0 + $0x60] sm:$0xff]  ;;  %v17_v16 = vld [vmem:[%s1002_s0 + $0x18] sm:$0xff] }
   0x7   :  { %521 = vmatpush.msra.mxu2 %v31_v2  ;;  %522 = vmatpush.msra.mxu3 %v31_v2  ;;  %v21_v17 = vld [vmem:[%s1002_s0 + $0x38] sm:$0xff]  ;;  %v690_v20 = vld [vmem:[%s1003_s2] ss:$0 sm:$0xff] }
   0x8   :  { %106 = vmatpush.msra.mxu0 %v30_v3  ;;  %523 = vmatpush.msra.mxu1 %v30_v3  ;;  %v25_v18 = vld [vmem:[%s1002_s0 + $0x58] sm:$0xff] }
   0x9   :  { %524 = vmatpush.msra.mxu2 %v30_v3  ;;  %525 = vmatpush.msra.mxu3 %v30_v3  ;;  %v29_v19 = vld [vmem:[%s1002_s0 + $0x78] sm:$0xff] }
   0xa   :  { %498 = vmatmul.msk.f32.vlgmr.msra.gmra.mxu0 %vm38_vm1, %v14_v4  ;;  %502 = vmatmul.msk.f32.vlgmr.msra.gmra.mxu1 %vm38_vm1, %v18_v5 }
   0xb   :  { %506 = vmatmul.msk.f32.vlgmr.msra.gmra.mxu2 %vm38_vm1, %v22_v6  ;;  %510 = vmatmul.msk.f32.vlgmr.msra.gmra.mxu3 %vm38_vm1, %v26_v7 }
  0x12   :  { %499 = vmatmul.msk.f32.gmra.mxu0 %vm38_vm1, %v15_v8  ;;  %503 = vmatmul.msk.f32.gmra.mxu1 %vm38_vm1, %v19_v9 }
  0x13   :  { %507 = vmatmul.msk.f32.gmra.mxu2 %vm38_vm1, %v23_v10  ;;  %511 = vmatmul.msk.f32.gmra.mxu3 %vm38_vm1, %v27_v11 }
  0x1a   :  { %500 = vmatmul.msk.f32.gmra.mxu0 %vm38_vm1, %v16_v12  ;;  %504 = vmatmul.msk.f32.gmra.mxu1 %vm38_vm1, %v20_v13 }
  0x1b   :  { %508 = vmatmul.msk.f32.gmra.mxu2 %vm38_vm1, %v24_v14  ;;  %512 = vmatmul.msk.f32.gmra.mxu3 %vm38_vm1, %v28_v15 }
  0x22   :  { %501 = vmatmul.msk.f32.gmra.mxu0 %vm38_vm1, %v17_v16  ;;  %505 = vmatmul.msk.f32.gmra.mxu1 %vm38_vm1, %v21_v17 }
  0x23   :  { %509 = vmatmul.msk.f32.gmra.mxu2 %vm38_vm1, %v25_v18  ;;  %513 = vmatmul.msk.f32.gmra.mxu3 %vm38_vm1, %v29_v19 }
  0x87   :  { %v108_v21 = vpop.f32.mrf.mxu0  ;;  %v120_v22 = vpop.f32.mrf.mxu1 }
  0x88   :  { %v693_v23 = vadd.f32 %v690_v20, %v108_v21  ;;  %v696_v24 = vadd.f32 %v690_v20, %v120_v22 }
  0x8a   :  { %v156_v25 = vsub.f32 0.0, %v693_v23  ;;  %v160_v26 = vsub.f32 0.0, %v696_v24 }
  0x8c   :  { %v172_v27 = vmul.f32 1.442695, %v156_v25  ;;  %v180_v28 = vmul.f32 1.442695, %v160_v26 }
  0x8e   :  { %527 = vpow2.f32 %v172_v27  ;;  %v132_v29 = vpop.f32.mrf.mxu2  ;;  %v144_v30 = vpop.f32.mrf.mxu3 }
  0x8f   :  { %529 = vpow2.f32 %v180_v28  ;;  %v701_v31 = vadd.f32 %v690_v20, %v132_v29  ;;  %v704_v32 = vadd.f32 %v690_v20, %v144_v30  ;;  %v111_v33 = vpop.f32.mrf.mxu0  ;;  %v123_v34 = vpop.f32.mrf.mxu1 }
  0x90   :  { %v707_v35 = vadd.f32 %v690_v20, %v111_v33  ;;  %v710_v36 = vadd.f32 %v690_v20, %v123_v34 }
  0x91   :  { %v164_v37 = vsub.f32 0.0, %v701_v31  ;;  %v168_v38 = vsub.f32 0.0, %v704_v32 }
  0x92   :  { %v157_v39 = vsub.f32 0.0, %v707_v35  ;;  %v161_v40 = vsub.f32 0.0, %v710_v36 }
  0x93   :  { %v188_v41 = vmul.f32 1.442695, %v164_v37  ;;  %v196_v42 = vmul.f32 1.442695, %v168_v38 }
  0x94   :  { %v528_v43 = vpop.eup %527  ;;  %v174_v46 = vmul.f32 1.442695, %v157_v39  ;;  %v182_v48 = vmul.f32 1.442695, %v161_v40 }
  0x95   :  { %v530_v44 = vpop.eup %529  ;;  %v204_v45 = vadd.f32 1.0, %v528_v43  ;;  %531 = vpow2.f32 %v188_v41 }
  0x96   :  { %v716_v47 = vadd.f32 1.0, %v530_v44  ;;  %533 = vpow2.f32 %v196_v42  ;;  %v135_v49 = vpop.f32.mrf.mxu2  ;;  %v147_v51 = vpop.f32.mrf.mxu3 }
  0x97   :  { %535 = vrcp.f32 %v204_v45  ;;  %v720_v50 = vadd.f32 %v690_v20, %v135_v49  ;;  %v229_v52 = vand.u32 2147483647, %v204_v45  ;;  %v231_v53 = vand.u32 2147483648, %v204_v45  ;;  %v114_v54 = vpop.f32.mrf.mxu0  ;;  %v126_v62 = vpop.f32.mrf.mxu1 }
  0x98   :  { %537 = vrcp.f32 %v716_v47  ;;  %v289_v56 = vand.u32 2147483647, %v716_v47  ;;  %v291_v59 = vand.u32 2147483648, %v716_v47  ;;  %v728_v61 = vadd.f32 %v690_v20, %v147_v51 }
  0x99   :  { %539 = vpow2.f32 %v174_v46  ;;  %v165_v57 = vsub.f32 0.0, %v720_v50  ;;  %vm225_vm2 = vweird.f32 %v204_v45  ;;  %vm285_vm3 = vweird.f32 %v716_v47 }
  0x9a   :  { %541 = vpow2.f32 %v182_v48  ;;  %v734_v1 = vadd.f32 %v690_v20, %v114_v54  ;;  %vm736_vm4 = vcmp.eq.f32.partialorder %v229_v52, 8.507059e+37  ;;  %v232_v5 = vor.u32 1.1754944e-38, %v231_v53 }
  0x9b   :  { %v532_v55 = vpop.eup %531  ;;  %vm742_vm6 = vcmp.eq.f32.partialorder %v289_v56, 8.507059e+37  ;;  %v190_v9 = vmul.f32 1.442695, %v165_v57  ;;  %v747_v10 = vadd.f32 %v690_v20, %v126_v62  ;;  %v292_v13 = vor.u32 1.1754944e-38, %v291_v59 }
  0x9c   :  { %v534_v58 = vpop.eup %533  ;;  %v725_v60 = vadd.f32 1.0, %v532_v55  ;;  %v169_v14 = vsub.f32 0.0, %v728_v61  ;;  %v158_v18 = vsub.f32 0.0, %v734_v1 }
  0x9d   :  { %v536_v63 = vpop.eup %535  ;;  %v731_v0 = vadd.f32 1.0, %v534_v58  ;;  %v162_v26 = vsub.f32 0.0, %v747_v10 }
  0x9e   :  { %v538_v2 = vpop.eup %537  ;;  %v221_v3 = vmul.f32 %v536_v63, %v204_v45  ;;  %543 = vrcp.f32 %v725_v60  ;;  %v349_v16 = vand.u32 2147483647, %v725_v60  ;;  %v351_v17 = vand.u32 2147483648, %v725_v60 }
  0x9f   :  { %v540_v6 = vpop.eup %539  ;;  %v281_v7 = vmul.f32 %v538_v2, %v716_v47  ;;  %545 = vrcp.f32 %v731_v0  ;;  %vm226_vm7 = vweird.f32 %v536_v63  ;;  %vm286_vm8 = vweird.f32 %v538_v2 }
  0xa0   :  { %v542_v11 = vpop.eup %541  ;;  %v222_v12 = vsub.f32 1.0, %v221_v3  ;;  %v754_v21 = vadd.f32 1.0, %v540_v6  ;;  %547 = vpow2.f32 %v190_v9  ;;  %vm345_vm9 = vweird.f32 %v725_v60  ;;  %vm227_vm10 = vmor %vm225_vm2, %vm226_vm7 }
  0xa1   :  { %v282_v15 = vsub.f32 1.0, %v281_v7  ;;  %v756_v22 = vadd.f32 1.0, %v542_v11  ;;  %v409_v29 = vand.u32 2147483647, %v731_v0  ;;  %vm764_vm11 = vcmp.eq.f32.partialorder %v349_v16, 8.507059e+37  ;;  %vm287_vm13 = vmor %vm285_vm3, %vm286_vm8 }
  0xa2   :  { %v223_v19 = vmul.f32 %v536_v63, %v222_v12  ;;  %549 = vrcp.f32 %v754_v21  ;;  %v352_v37 = vor.u32 1.1754944e-38, %v351_v17  ;;  %vm405_vm12 = vweird.f32 %v731_v0 }
  0xa3   :  { %v283_v25 = vmul.f32 %v538_v2, %v282_v15  ;;  %v411_v40 = vand.u32 2147483648, %v731_v0  ;;  %551 = vrcp.f32 %v756_v22  ;;  %v198_v41 = vmul.f32 1.442695, %v169_v14  ;;  %v138_v14 = vpop.f32.mrf.mxu2 }
  0xa4   :  { %v544_v27 = vpop.eup %543  ;;  %v224_v28 = vadd.f32 %v536_v63, %v223_v19  ;;  %vm780_vm14 = vcmp.eq.f32.partialorder %v409_v29, 8.507059e+37  ;;  %v244_v49 = vand.u32 2147483647, %v754_v21  ;;  %vm240_vm0 = vweird.f32 %v754_v21  ;;  %v150_v19 = vpop.f32.mrf.mxu3 }
  0xa5   :  { %v284_v30 = vadd.f32 %v538_v2, %v283_v25  ;;  %v341_v33 = vmul.f32 %v544_v27, %v725_v60  ;;  %v546_v38 = vpop.eup %545  ;;  %vm346_vm15 = vweird.f32 %v544_v27  ;;  %553 = vpow2.f32 %v198_v41  ;;  %v117_v25 = vpop.f32.mrf.mxu0 }
  0xa6   :  { %v228_v39 = vsel %vm227_vm10, %v536_v63, %v224_v28  ;;  %v401_v45 = vmul.f32 %v546_v38, %v731_v0  ;;  %v548_v51 = vpop.eup %547  ;;  %vm406_vm1 = vweird.f32 %v546_v38  ;;  %vm347_vm2 = vmor %vm345_vm9, %vm346_vm15  ;;  %vm800_vm3 = vcmp.eq.f32.partialorder %v244_v49, 8.507059e+37 }
  0xa7   :  { %v233_v42 = vsel %vm736_vm4, %v232_v5, %v228_v39  ;;  %v288_v43 = vsel %vm287_vm13, %v538_v2, %v284_v30  ;;  %v342_v44 = vsub.f32 1.0, %v341_v33  ;;  %v791_v56 = vadd.f32 1.0, %v548_v51  ;;  %vm407_vm4 = vmor %vm405_vm12, %vm406_vm1 }
  0xa8   :  { %v460_v46 = vmul.f32 %v233_v42, %v693_v23  ;;  %v293_v48 = vsel %vm742_vm6, %v292_v13, %v288_v43  ;;  %v402_v54 = vsub.f32 1.0, %v401_v45  ;;  %v550_v55 = vpop.eup %549  ;;  %v412_v23 = vor.u32 1.1754944e-38, %v411_v40 }
  0xa9   :  { %v464_v52 = vmul.f32 %v293_v48, %v696_v24  ;;  %v343_v53 = vmul.f32 %v544_v27, %v342_v44  ;;  %v236_v58 = vmul.f32 %v550_v55, %v754_v21  ;;  %v552_v59 = vpop.eup %551  ;;  %v246_v63 = vand.u32 2147483648, %v754_v21  ;;  %v129_v44 = vpop.f32.mrf.mxu1 }
  0xaa   :  { %477 = vst.msk [vmem:[%s1004_s3] sm:$0xff] %vm476_vm5, %v460_v46  ;;  %v403_v57 = vmul.f32 %v546_v38, %v402_v54  ;;  %555 = vrcp.f32 %v791_v56  ;;  %v176_v2 = vmul.f32 1.442695, %v158_v18  ;;  %v296_v6 = vmul.f32 %v552_v59, %v756_v22 }
  0xab   :  { %481 = vst.msk [vmem:[%s1004_s3 + $0x20] sm:$0xff] %vm476_vm5, %v464_v52  ;;  %v344_v24 = vadd.f32 %v544_v27, %v343_v53  ;;  %v237_v5 = vsub.f32 1.0, %v236_v58  ;;  %vm241_vm6 = vweird.f32 %v550_v55  ;;  %v304_v60 = vand.u32 2147483647, %v756_v22  ;;  %v554_v15 = vpop.eup %553 }
  0xac   :  { %v404_v4 = vadd.f32 %v546_v38, %v403_v57  ;;  %v306_v8 = vand.u32 2147483648, %v756_v22  ;;  %v297_v13 = vsub.f32 1.0, %v296_v6  ;;  %vm300_vm7 = vweird.f32 %v756_v22  ;;  %vm242_vm9 = vmor %vm240_vm0, %vm241_vm6 }
  0xad   :  { %v348_v3 = vsel %vm347_vm2, %v544_v27, %v344_v24  ;;  %v238_v12 = vmul.f32 %v550_v55, %v237_v5  ;;  %vm301_vm8 = vweird.f32 %v552_v59  ;;  %557 = vpow2.f32 %v176_v2 }
  0xae   :  { %v353_v7 = vsel %vm764_vm11, %v352_v37, %v348_v3  ;;  %v408_v11 = vsel %vm407_vm4, %v546_v38, %v404_v4  ;;  %v298_v17 = vmul.f32 %v552_v59, %v297_v13  ;;  %v822_v18 = vadd.f32 1.0, %v554_v15  ;;  %vm302_vm11 = vmor %vm300_vm7, %vm301_vm8  ;;  %v141_v4 = vpop.f32.mrf.mxu2 }
  0xaf   :  { %v468_v9 = vmul.f32 %v353_v7, %v701_v31  ;;  %v413_v16 = vsel %vm780_vm14, %v412_v23, %v408_v11  ;;  %v239_v31 = vadd.f32 %v550_v55, %v238_v12  ;;  %v247_v28 = vor.u32 1.1754944e-38, %v246_v63 }
  0xb0   :  { %v472_v0 = vmul.f32 %v413_v16, %v704_v32  ;;  %v556_v27 = vpop.eup %555  ;;  %vm827_vm10 = vcmp.eq.f32.partialorder %v304_v60, 8.507059e+37  ;;  %v184_v30 = vmul.f32 1.442695, %v162_v26  ;;  %v834_v32 = vadd.f32 %v690_v20, %v138_v14 }
  0xb1   :  { %485 = vst.msk [vmem:[%s1004_s3 + $0x40] sm:$0xff] %vm476_vm5, %v468_v9  ;;  %v243_v33 = vsel %vm242_vm9, %v550_v55, %v239_v31  ;;  %v299_v34 = vadd.f32 %v552_v59, %v298_v17  ;;  %v307_v21 = vor.u32 1.1754944e-38, %v306_v8  ;;  %v356_v37 = vmul.f32 %v556_v27, %v791_v56 }
  0xb2   :  { %489 = vst.msk [vmem:[%s1004_s3 + $0x60] sm:$0xff] %vm476_vm5, %v472_v0  ;;  %v248_v38 = vsel %vm800_vm3, %v247_v28, %v243_v33  ;;  %559 = vrcp.f32 %v822_v18  ;;  %v848_v26 = vadd.f32 %v690_v20, %v150_v19  ;;  %v851_v39 = vadd.f32 %v690_v20, %v117_v25  ;;  %v153_v19 = vpop.f32.mrf.mxu3 }
  0xb3   :  { %v461_v40 = vmul.f32 %v248_v38, %v707_v35  ;;  %v303_v41 = vsel %vm302_vm11, %v552_v59, %v299_v34  ;;  %v357_v42 = vsub.f32 1.0, %v356_v37  ;;  %v364_v43 = vand.u32 2147483647, %v791_v56  ;;  %v558_v45 = vpop.eup %557 }
  0xb4   :  { %v308_v22 = vsel %vm827_vm10, %v307_v21, %v303_v41  ;;  %v366_v46 = vand.u32 2147483648, %v791_v56  ;;  %561 = vpow2.f32 %v184_v30  ;;  %v166_v48 = vsub.f32 0.0, %v834_v32 }
  0xb5   :  { %478 = vst.msk [vmem:[%s1004_s3 + $0x8] sm:$0xff] %vm476_vm5, %v461_v40  ;;  %v465_v35 = vmul.f32 %v308_v22, %v710_v36  ;;  %v358_v47 = vmul.f32 %v556_v27, %v357_v42  ;;  %vm361_vm12 = vweird.f32 %v556_v27  ;;  %v864_v49 = vadd.f32 1.0, %v558_v45 }
  0xb6   :  { %v192_v51 = vmul.f32 1.442695, %v166_v48  ;;  %v170_v52 = vsub.f32 0.0, %v848_v26  ;;  %v159_v53 = vsub.f32 0.0, %v851_v39  ;;  %v869_v54 = vadd.f32 %v690_v20, %v129_v44 }
  0xb7   :  { %482 = vst.msk [vmem:[%s1004_s3 + $0x28] sm:$0xff] %vm476_vm5, %v465_v35  ;;  %v359_v55 = vadd.f32 %v556_v27, %v358_v47  ;;  %vm360_vm13 = vweird.f32 %v791_v56  ;;  %563 = vrcp.f32 %v864_v49  ;;  %v367_v23 = vor.u32 1.1754944e-38, %v366_v46 }
  0xb8   :  { %v560_v36 = vpop.eup %559  ;;  %vm362_vm14 = vmor %vm360_vm13, %vm361_vm12  ;;  %565 = vpow2.f32 %v192_v51  ;;  %v200_v24 = vmul.f32 1.442695, %v170_v52  ;;  %v178_v57 = vmul.f32 1.442695, %v159_v53  ;;  %vm365_vm15 = vcmp.eq.f32.partialorder %v364_v43, 8.507059e+37 }
  0xb9   :  { %v363_v58 = vsel %vm362_vm14, %v556_v27, %v359_v55  ;;  %v416_v59 = vmul.f32 %v560_v36, %v822_v18  ;;  %v424_v62 = vand.u32 2147483647, %v822_v18  ;;  %v426_v3 = vand.u32 2147483648, %v822_v18 }
  0xba   :  { %v562_v63 = vpop.eup %561  ;;  %v368_v2 = vsel %vm365_vm15, %v367_v23, %v363_v58  ;;  %567 = vpow2.f32 %v200_v24  ;;  %v163_v56 = vsub.f32 0.0, %v869_v54  ;;  %vm421_vm0 = vweird.f32 %v560_v36 }
  0xbb   :  { %v469_v5 = vmul.f32 %v368_v2, %v720_v50  ;;  %v417_v6 = vsub.f32 1.0, %v416_v59  ;;  %v882_v7 = vadd.f32 1.0, %v562_v63  ;;  %569 = vpow2.f32 %v178_v57 }
  0xbc   :  { %v186_v60 = vmul.f32 1.442695, %v163_v56  ;;  %v890_v11 = vadd.f32 %v690_v20, %v141_v4  ;;  %vm420_vm1 = vweird.f32 %v822_v18  ;;  %vm425_vm2 = vcmp.eq.f32.partialorder %v424_v62, 8.507059e+37 }
  0xbd   :  { %v564_v8 = vpop.eup %563  ;;  %486 = vst.msk [vmem:[%s1004_s3 + $0x48] sm:$0xff] %vm476_vm5, %v469_v5  ;;  %v418_v9 = vmul.f32 %v560_v36, %v417_v6  ;;  %571 = vrcp.f32 %v882_v7  ;;  %v427_v14 = vor.u32 1.1754944e-38, %v426_v3  ;;  %vm422_vm3 = vmor %vm420_vm1, %vm421_vm0  ;;  %v259_v31 = vand.u32 2147483647, %v864_v49 }
  0xbe   :  { %v566_v12 = vpop.eup %565  ;;  %v251_v50 = vmul.f32 %v564_v8, %v864_v49  ;;  %v261_v17 = vand.u32 2147483648, %v864_v49  ;;  %573 = vpow2.f32 %v186_v60  ;;  %vm255_vm4 = vweird.f32 %v864_v49 }
  0xbf   :  { %v419_v13 = vadd.f32 %v560_v36, %v418_v9  ;;  %v894_v15 = vadd.f32 1.0, %v566_v12  ;;  %v167_v18 = vsub.f32 0.0, %v890_v11  ;;  %vm256_vm6 = vweird.f32 %v564_v8 }
  0xc0   :  { %v568_v16 = vpop.eup %567  ;;  %v252_v0 = vsub.f32 1.0, %v251_v50  ;;  %v907_v37 = vadd.f32 %v690_v20, %v153_v19  ;;  %vm260_vm7 = vcmp.eq.f32.partialorder %v259_v31, 8.507059e+37  ;;  %v262_v40 = vor.u32 1.1754944e-38, %v261_v17  ;;  %vm257_vm8 = vmor %vm255_vm4, %vm256_vm6 }
  0xc1   :  { %v570_v25 = vpop.eup %569  ;;  %v423_v27 = vsel %vm422_vm3, %v560_v36, %v419_v13  ;;  %575 = vrcp.f32 %v894_v15  ;;  %v901_v30 = vadd.f32 1.0, %v568_v16  ;;  %vm315_vm9 = vweird.f32 %v882_v7 }
  0xc2   :  { %v428_v28 = vsel %vm425_vm2, %v427_v14, %v423_v27  ;;  %v253_v29 = vmul.f32 %v564_v8, %v252_v0  ;;  %v904_v21 = vadd.f32 1.0, %v570_v25  ;;  %v194_v20 = vmul.f32 1.442695, %v167_v18 }
  0xc3   :  { %v572_v33 = vpop.eup %571  ;;  %v473_v34 = vmul.f32 %v428_v28, %v728_v61  ;;  %v319_v61 = vand.u32 2147483647, %v882_v7  ;;  %577 = vrcp.f32 %v901_v30  ;;  %v321_v45 = vand.u32 2147483648, %v882_v7 }
  0xc4   :  { %v254_v38 = vadd.f32 %v564_v8, %v253_v29  ;;  %v311_v41 = vmul.f32 %v572_v33, %v882_v7  ;;  %v574_v42 = vpop.eup %573  ;;  %579 = vrcp.f32 %v904_v21  ;;  %v379_v48 = vand.u32 2147483647, %v894_v15 }
  0xc5   :  { %490 = vst.msk [vmem:[%s1004_s3 + $0x68] sm:$0xff] %vm476_vm5, %v473_v34  ;;  %v381_v35 = vand.u32 2147483648, %v894_v15  ;;  %v171_v47 = vsub.f32 0.0, %v907_v37  ;;  %vm316_vm10 = vweird.f32 %v572_v33  ;;  %vm926_vm11 = vcmp.eq.f32.partialorder %v319_v61, 8.507059e+37 }
  0xc6   :  { %v258_v43 = vsel %vm257_vm8, %v564_v8, %v254_v38  ;;  %v312_v44 = vsub.f32 1.0, %v311_v41  ;;  %v930_v55 = vadd.f32 1.0, %v574_v42  ;;  %581 = vpow2.f32 %v194_v20  ;;  %vm317_vm13 = vmor %vm315_vm9, %vm316_vm10 }
  0xc7   :  { %v576_v22 = vpop.eup %575  ;;  %v263_v46 = vsel %vm260_vm7, %v262_v40, %v258_v43  ;;  %v322_v23 = vor.u32 1.1754944e-38, %v321_v45  ;;  %vm375_vm12 = vweird.f32 %v894_v15  ;;  %vm939_vm14 = vcmp.eq.f32.partialorder %v379_v48, 8.507059e+37 }
  0xc8   :  { %v462_v49 = vmul.f32 %v263_v46, %v734_v1  ;;  %v313_v51 = vmul.f32 %v572_v33, %v312_v44  ;;  %v371_v52 = vmul.f32 %v576_v22, %v894_v15  ;;  %v382_v58 = vor.u32 1.1754944e-38, %v381_v35 }
  0xc9   :  { %v578_v1 = vpop.eup %577  ;;  %583 = vrcp.f32 %v930_v55  ;;  %v202_v59 = vmul.f32 1.442695, %v171_v47  ;;  %vm376_vm15 = vweird.f32 %v576_v22  ;;  %vm435_vm0 = vweird.f32 %v901_v30 }
  0xca   :  { %479 = vst.msk [vmem:[%s1004_s3 + $0x10] sm:$0xff] %vm476_vm5, %v462_v49  ;;  %v314_v36 = vadd.f32 %v572_v33, %v313_v51  ;;  %v372_v24 = vsub.f32 1.0, %v371_v52  ;;  %v580_v62 = vpop.eup %579  ;;  %v431_v3 = vmul.f32 %v578_v1, %v901_v30  ;;  %v439_v4 = vand.u32 2147483647, %v901_v30  ;;  %vm377_vm1 = vmor %vm375_vm12, %vm376_vm15 }
  0xcb   :  { %v266_v5 = vmul.f32 %v580_v62, %v904_v21  ;;  %v441_v8 = vand.u32 2147483648, %v901_v30  ;;  %v274_v50 = vand.u32 2147483647, %v904_v21  ;;  %v276_v13 = vand.u32 2147483648, %v904_v21 }
  0xcc   :  { %v318_v63 = vsel %vm317_vm13, %v572_v33, %v314_v36  ;;  %v373_v2 = vmul.f32 %v576_v22, %v372_v24  ;;  %v432_v60 = vsub.f32 1.0, %v431_v3  ;;  %v582_v9 = vpop.eup %581  ;;  %585 = vpow2.f32 %v202_v59 }
  0xcd   :  { %v323_v56 = vsel %vm926_vm11, %v322_v23, %v318_v63  ;;  %v267_v12 = vsub.f32 1.0, %v266_v5  ;;  %vm436_vm2 = vweird.f32 %v578_v1  ;;  %v215_v16 = vadd.f32 1.0, %v582_v9 }
  0xce   :  { %v466_v6 = vmul.f32 %v323_v56, %v747_v10  ;;  %v374_v7 = vadd.f32 %v576_v22, %v373_v2  ;;  %v433_v14 = vmul.f32 %v578_v1, %v432_v60  ;;  %vm270_vm3 = vweird.f32 %v904_v21  ;;  %vm437_vm7 = vmor %vm435_vm0, %vm436_vm2 }
  0xcf   :  { %v584_v0 = vpop.eup %583  ;;  %v268_v31 = vmul.f32 %v580_v62, %v267_v12  ;;  %vm271_vm4 = vweird.f32 %v580_v62  ;;  %vm440_vm6 = vcmp.eq.f32.partialorder %v439_v4, 8.507059e+37  ;;  %v442_v27 = vor.u32 1.1754944e-38, %v441_v8 }
  0xd0   :  { %483 = vst.msk [vmem:[%s1004_s3 + $0x30] sm:$0xff] %vm476_vm5, %v466_v6  ;;  %v378_v10 = vsel %vm377_vm1, %v576_v22, %v374_v7  ;;  %v434_v19 = vadd.f32 %v578_v1, %v433_v14  ;;  %v326_v25 = vmul.f32 %v584_v0, %v930_v55  ;;  %vm275_vm8 = vcmp.eq.f32.partialorder %v274_v50, 8.507059e+37  ;;  %vm272_vm9 = vmor %vm270_vm3, %vm271_vm4 }
  0xd1   :  { %v383_v15 = vsel %vm939_vm14, %v382_v58, %v378_v10  ;;  %v269_v18 = vadd.f32 %v580_v62, %v268_v31  ;;  %587 = vrcp.f32 %v215_v16  ;;  %v277_v29 = vor.u32 1.1754944e-38, %v276_v13 }
  0xd2   :  { %v470_v17 = vmul.f32 %v383_v15, %v834_v32  ;;  %v438_v28 = vsel %vm437_vm7, %v578_v1, %v434_v19  ;;  %v327_v32 = vsub.f32 1.0, %v326_v25  ;;  %vm330_vm10 = vweird.f32 %v930_v55  ;;  %v586_v33 = vpop.eup %585 }
  0xd3   :  { %v443_v34 = vsel %vm440_vm6, %v442_v27, %v438_v28  ;;  %v273_v21 = vsel %vm272_vm9, %v580_v62, %v269_v18  ;;  %v334_v30 = vand.u32 2147483647, %v930_v55  ;;  %v336_v38 = vand.u32 2147483648, %v930_v55 }
  0xd4   :  { %487 = vst.msk [vmem:[%s1004_s3 + $0x50] sm:$0xff] %vm476_vm5, %v470_v17  ;;  %v474_v40 = vmul.f32 %v443_v34, %v848_v26  ;;  %v278_v41 = vsel %vm275_vm8, %v277_v29, %v273_v21  ;;  %v328_v61 = vmul.f32 %v584_v0, %v327_v32  ;;  %vm331_vm11 = vweird.f32 %v584_v0 }
  0xd5   :  { %v463_v20 = vmul.f32 %v278_v41, %v851_v39  ;;  %v219_v42 = vadd.f32 1.0, %v586_v33  ;;  %vm332_vm12 = vmor %vm330_vm10, %vm331_vm11  ;;  %v337_v26 = vor.u32 1.1754944e-38, %v336_v38  ;;  %vm335_vm13 = vcmp.eq.f32.partialorder %v334_v30, 8.507059e+37 }
  0xd6   :  { %491 = vst.msk [vmem:[%s1004_s3 + $0x70] sm:$0xff] %vm476_vm5, %v474_v40  ;;  %v329_v43 = vadd.f32 %v584_v0, %v328_v61  ;;  %v396_v35 = vand.u32 2147483648, %v215_v16  ;;  %v394_v49 = vand.u32 2147483647, %v215_v16  ;;  %vm390_vm15 = vweird.f32 %v215_v16 }
  0xd7   :  { %v588_v44 = vpop.eup %587  ;;  %480 = vst.msk [vmem:[%s1004_s3 + $0x18] sm:$0xff] %vm476_vm5, %v463_v20  ;;  %589 = vrcp.f32 %v219_v42  ;;  %v456_v24 = vand.u32 2147483648, %v219_v42  ;;  %v454_v58 = vand.u32 2147483647, %v219_v42  ;;  %vm450_vm3 = vweird.f32 %v219_v42 }
  0xd8   :  { %v333_v45 = vsel %vm332_vm12, %v584_v0, %v329_v43  ;;  %v386_v39 = vmul.f32 %v588_v44, %v215_v16  ;;  %vm391_vm14 = vweird.f32 %v588_v44  ;;  %v397_v55 = vor.u32 1.1754944e-38, %v396_v35 }
  0xd9   :  { %v338_v22 = vsel %vm335_vm13, %v337_v26, %v333_v45  ;;  %vm392_vm0 = vmor %vm390_vm15, %vm391_vm14  ;;  %vm395_vm1 = vcmp.eq.f32.partialorder %v394_v49, 8.507059e+37  ;;  %v457_v62 = vor.u32 1.1754944e-38, %v456_v24  ;;  %vm455_vm6 = vcmp.eq.f32.partialorder %v454_v58, 8.507059e+37 }
  0xda   :  { %v467_v46 = vmul.f32 %v338_v22, %v869_v54  ;;  %v387_v48 = vsub.f32 1.0, %v386_v39 }
  0xdc   :  { %484 = vst.msk [vmem:[%s1004_s3 + $0x38] sm:$0xff] %vm476_vm5, %v467_v46  ;;  %v388_v47 = vmul.f32 %v588_v44, %v387_v48 }
  0xdd   :  { %v590_v51 = vpop.eup %589 }
  0xde   :  { %v389_v52 = vadd.f32 %v588_v44, %v388_v47  ;;  %v446_v53 = vmul.f32 %v590_v51, %v219_v42  ;;  %vm451_vm2 = vweird.f32 %v590_v51 }
  0xdf   :  { %vm452_vm4 = vmor %vm450_vm3, %vm451_vm2 }
  0xe0   :  { %v393_v36 = vsel %vm392_vm0, %v588_v44, %v389_v52  ;;  %v447_v23 = vsub.f32 1.0, %v446_v53 }
  0xe1   :  { %v398_v54 = vsel %vm395_vm1, %v397_v55, %v393_v36 }
  0xe2   :  { %v471_v1 = vmul.f32 %v398_v54, %v890_v11  ;;  %v448_v57 = vmul.f32 %v590_v51, %v447_v23 }
  0xe4   :  { %488 = vst.msk [vmem:[%s1004_s3 + $0x58] sm:$0xff] %vm476_vm5, %v471_v1  ;;  %v449_v59 = vadd.f32 %v590_v51, %v448_v57 }
  0xe6   :  { %v453_v63 = vsel %vm452_vm4, %v590_v51, %v449_v59 }
  0xe7   :  { %v458_v2 = vsel %vm455_vm6, %v457_v62, %v453_v63 }
  0xe8   :  { %v475_v3 = vmul.f32 %v458_v2, %v907_v37 }
  0xea   :  { %492 = vst.msk [vmem:[%s1004_s3 + $0x78] sm:$0xff] %vm476_vm5, %v475_v3 }

</bundles_post_ra>
